<compile_context>
chip_gen: v5e
topology: v5e:2x2
jax: 0.10.0
libtpu: 0.0.40
codegen_flags: <defaults>
</compile_context>

<pallas_src>
import functools

import jax
import jax.numpy as jnp
from jax.experimental import pallas as pl
from jax.experimental.pallas import tpu as pltpu


def actor_kernel(x_ref, w1_ref, b1_ref, w2_ref, b2_ref, w3_ref, b3_ref, probs_ref,
                 *, out_dim):
    # x: (TB, D_in) bf16; weights bf16; biases f32; output f32 (TB, out_pad)
    x = x_ref[...]

    # Layer 1: Linear (bf16 MXU, f32 accumulate) + Tanh in f32
    h1 = jnp.tanh(
        jnp.dot(x, w1_ref[...], preferred_element_type=jnp.float32) + b1_ref[...]
    ).astype(jnp.bfloat16)

    # Layer 2: Linear + Tanh
    h2 = jnp.tanh(
        jnp.dot(h1, w2_ref[...], preferred_element_type=jnp.float32) + b2_ref[...]
    ).astype(jnp.bfloat16)

    # Layer 3: Linear into lane-dense padded width (out_pad = multiple of 128)
    logits = jnp.dot(h2, w3_ref[...], preferred_element_type=jnp.float32) + b3_ref[...]

    # Mask the padded output lanes so they get zero probability.
    lane = jax.lax.broadcasted_iota(jnp.int32, logits.shape, 1)
    logits = jnp.where(lane < out_dim, logits, -jnp.inf)

    # Numerically stable Softmax(dim=-1) in f32.
    m = jnp.max(logits, axis=-1, keepdims=True)
    e = jnp.exp(logits - m)
    denom = jnp.sum(e, axis=-1, keepdims=True)
    probs_ref[...] = (e * pl.reciprocal(denom, approx=True)).astype(probs_ref.dtype)


def _round_up(a, m):
    return ((a + m - 1) // m) * m


def actor_forward(x, params, *, tb=1024):
    """Runs the fused actor MLP kernel. Returns class probabilities (B, out_dim), f32."""
    w1, b1, w2, b2, w3, b3 = params
    B, d_in = x.shape
    h1_dim = w1.shape[1]
    h2_dim = w2.shape[1]
    out_dim = w3.shape[1]
    out_pad = _round_up(max(out_dim, 128), 128)

    # Batch tile: multiple of 8, capped at `tb` (sized for v7x's 64 MiB VMEM with big margin).
    TB = _round_up(min(tb, _round_up(B, 8)), 8)
    B_pad = _round_up(B, TB)
    grid = (B_pad // TB,)

    # Activations to bf16 (halves x DMA bytes); pad batch to the tile grid.
    x_p = x
    if B_pad != B:
        x_p = jnp.pad(x_p, ((0, B_pad - B), (0, 0)))
    x_p = x_p.astype(jnp.bfloat16)

    # Weights to bf16; last layer padded to lane-dense out_pad. Biases stay f32.
    w1b = w1.astype(jnp.bfloat16)
    w2b = w2.astype(jnp.bfloat16)
    w3b = jnp.pad(w3, ((0, 0), (0, out_pad - out_dim))).astype(jnp.bfloat16)
    b3p = jnp.pad(b3, ((0, 0), (0, out_pad - out_dim)))

    kernel = functools.partial(actor_kernel, out_dim=out_dim)

    flops = 2 * B_pad * (d_in * h1_dim + h1_dim * h2_dim + h2_dim * out_pad)
    transcendentals = B_pad * (h1_dim + h2_dim + out_pad)
    bytes_accessed = (
        x_p.size * 2 + w1b.size * 2 + w2b.size * 2 + w3b.size * 2
        + b1.size * 4 + b2.size * 4 + b3p.size * 4 + B_pad * out_pad * 4
    )

    probs_pad = pl.pallas_call(
        kernel,
        out_shape=jax.ShapeDtypeStruct((B_pad, out_pad), jnp.float32),
        grid=grid,
        in_specs=[
            pl.BlockSpec((TB, d_in), lambda i: (i, 0)),          # x: tiled over batch
            pl.BlockSpec((d_in, h1_dim), lambda i: (0, 0)),      # weights: VMEM-resident
            pl.BlockSpec((1, h1_dim), lambda i: (0, 0)),
            pl.BlockSpec((h1_dim, h2_dim), lambda i: (0, 0)),
            pl.BlockSpec((1, h2_dim), lambda i: (0, 0)),
            pl.BlockSpec((h2_dim, out_pad), lambda i: (0, 0)),
            pl.BlockSpec((1, out_pad), lambda i: (0, 0)),
        ],
        out_specs=pl.BlockSpec((TB, out_pad), lambda i: (i, 0)),
        compiler_params=pltpu.CompilerParams(
            dimension_semantics=("parallel",),
        ),
        cost_estimate=pl.CostEstimate(
            flops=flops,
            transcendentals=transcendentals,
            bytes_accessed=bytes_accessed,
        ),
    )(x_p, w1b, b1, w2b, b2, w3b, b3p)

    return probs_pad[:B, :out_dim]


def init_params(key, input_dim, hl1_dim, hl2_dim, out_dim):
    """Deterministic init mimicking nn.Linear default (uniform +/- 1/sqrt(fan_in)).
    Weights stored as (in_features, out_features) so the kernel computes x @ W + b."""
    keys = jax.random.split(key, 6)

    def linear(kw, kb, fan_in, fan_out):
        bound = 1.0 / jnp.sqrt(float(fan_in))
        w = jax.random.uniform(kw, (fan_in, fan_out), jnp.float32, -bound, bound)
        b = jax.random.uniform(kb, (1, fan_out), jnp.float32, -bound, bound)
        return w, b

    w1, b1 = linear(keys[0], keys[1], input_dim, hl1_dim)
    w2, b2 = linear(keys[2], keys[3], hl1_dim, hl2_dim)
    w3, b3 = linear(keys[4], keys[5], hl2_dim, out_dim)
    return (w1, b1, w2, b2, w3, b3)


def actor_forward_ref(x, params):
    w1, b1, w2, b2, w3, b3 = params
    h1 = jnp.tanh(x @ w1 + b1)
    h2 = jnp.tanh(h1 @ w2 + b2)
    logits = h2 @ w3 + b3
    return jax.nn.softmax(logits, axis=-1)


if __name__ == "__main__":
    # Small shapes consistent with the module: state (B, input_dim), MLP -> out_dim probs.
    B, input_dim, hl1_dim, hl2_dim, out_dim = 8, 16, 32, 32, 8

    key = jax.random.PRNGKey(0)
    k_x, k_p, k_big = jax.random.split(key, 3)
    x = jax.random.normal(k_x, (B, input_dim), jnp.float32)
    params = init_params(k_p, input_dim, hl1_dim, hl2_dim, out_dim)

    # Small-batch check (grid = 1 step).
    probs = jax.block_until_ready(actor_forward(x, params))
    ref = actor_forward_ref(x, params)
    assert probs.shape == (B, out_dim)
    # bf16 matmuls + approx reciprocal => relaxed tolerance vs f32 reference.
    assert jnp.allclose(probs, ref, atol=2e-2, rtol=2e-2)
    assert jnp.allclose(jnp.sum(probs, axis=-1), jnp.ones((B,)), atol=1e-2)

    # Rollout-sized batch: exercises batch tiling (TB=512 -> 2 grid steps) and padding.
    Bb = 1000
    xb = jax.random.normal(k_big, (Bb, input_dim), jnp.float32)
    probs_b = jax.block_until_ready(actor_forward(xb, params, tb=512))
    ref_b = actor_forward_ref(xb, params)
    assert probs_b.shape == (Bb, out_dim)
    assert jnp.allclose(probs_b, ref_b, atol=2e-2, rtol=2e-2)
    assert jnp.allclose(jnp.sum(probs_b, axis=-1), jnp.ones((Bb,)), atol=1e-2)

    # NOTE: Categorical sampling / log_prob / entropy from `act()` are distribution
    # utilities computed from `probs`; the hot path (MLP + softmax) is in the kernel.
    print("KERNEL_OK")
</pallas_src>

<mosaic_0001>
module attributes {stable_mosaic.version = 11 : i64} {
  func.func @actor_kernel(%arg0: i32, %arg1: memref<8x16xbf16, #tpu.memory_space<vmem>>, %arg2: memref<16x32xbf16, #tpu.memory_space<vmem>>, %arg3: memref<1x32xf32, #tpu.memory_space<vmem>>, %arg4: memref<32x32xbf16, #tpu.memory_space<vmem>>, %arg5: memref<1x32xf32, #tpu.memory_space<vmem>>, %arg6: memref<32x128xbf16, #tpu.memory_space<vmem>>, %arg7: memref<1x128xf32, #tpu.memory_space<vmem>>, %arg8: memref<8x128xf32, #tpu.memory_space<vmem>>) attributes {dimension_semantics = [#tpu.dimension_semantics<parallel>], iteration_bounds = array<i64: 1>, scalar_prefetch = 0 : i64, scratch_operands = 0 : i64, tpu.core_type = #tpu.core_type<tc>, window_params = [{transform_indices = @transform_0, window_bounds = array<i64: 8, 16>}, {pipeline_mode = #tpu.pipeline_mode<synchronous>, transform_indices = @transform_1, window_bounds = array<i64: 16, 32>}, {pipeline_mode = #tpu.pipeline_mode<synchronous>, transform_indices = @transform_2, window_bounds = array<i64: 1, 32>}, {pipeline_mode = #tpu.pipeline_mode<synchronous>, transform_indices = @transform_3, window_bounds = array<i64: 32, 32>}, {pipeline_mode = #tpu.pipeline_mode<synchronous>, transform_indices = @transform_4, window_bounds = array<i64: 1, 32>}, {pipeline_mode = #tpu.pipeline_mode<synchronous>, transform_indices = @transform_5, window_bounds = array<i64: 32, 128>}, {pipeline_mode = #tpu.pipeline_mode<synchronous>, transform_indices = @transform_6, window_bounds = array<i64: 1, 128>}, {transform_indices = @transform_7, window_bounds = array<i64: 8, 128>}]} {
    %c0 = arith.constant 0 : index
    %c0_0 = arith.constant 0 : index
    %0 = vector.load %arg1[%c0, %c0_0] : memref<8x16xbf16, #tpu.memory_space<vmem>>, vector<8x16xbf16>
    %c0_1 = arith.constant 0 : index
    %c0_2 = arith.constant 0 : index
    %1 = vector.load %arg2[%c0_1, %c0_2] : memref<16x32xbf16, #tpu.memory_space<vmem>>, vector<16x32xbf16>
    %cst = arith.constant dense<0.000000e+00> : vector<8x32xf32>
    %2 = tpu.matmul %0, %1, %cst {dimension_numbers = #tpu.dot_dimension_numbers<[1], [0], [0], [1], [0, 0, 1, 1], [], []>} : vector<8x16xbf16>, vector<16x32xbf16>, vector<8x32xf32> -> vector<8x32xf32>
    %c0_3 = arith.constant 0 : index
    %c0_4 = arith.constant 0 : index
    %3 = vector.load %arg3[%c0_3, %c0_4] : memref<1x32xf32, #tpu.memory_space<vmem>>, vector<1x32xf32>
    %4 = vector.broadcast %3 : vector<1x32xf32> to vector<8x32xf32>
    %5 = arith.addf %2, %4 : vector<8x32xf32>
    %6 = math.tanh %5 : vector<8x32xf32>
    %7 = arith.truncf %6 : vector<8x32xf32> to vector<8x32xbf16>
    %c0_5 = arith.constant 0 : index
    %c0_6 = arith.constant 0 : index
    %8 = vector.load %arg4[%c0_5, %c0_6] : memref<32x32xbf16, #tpu.memory_space<vmem>>, vector<32x32xbf16>
    %cst_7 = arith.constant dense<0.000000e+00> : vector<8x32xf32>
    %9 = tpu.matmul %7, %8, %cst_7 {dimension_numbers = #tpu.dot_dimension_numbers<[1], [0], [0], [1], [0, 0, 1, 1], [], []>} : vector<8x32xbf16>, vector<32x32xbf16>, vector<8x32xf32> -> vector<8x32xf32>
    %c0_8 = arith.constant 0 : index
    %c0_9 = arith.constant 0 : index
    %10 = vector.load %arg5[%c0_8, %c0_9] : memref<1x32xf32, #tpu.memory_space<vmem>>, vector<1x32xf32>
    %11 = vector.broadcast %10 : vector<1x32xf32> to vector<8x32xf32>
    %12 = arith.addf %9, %11 : vector<8x32xf32>
    %13 = math.tanh %12 : vector<8x32xf32>
    %14 = arith.truncf %13 : vector<8x32xf32> to vector<8x32xbf16>
    %c0_10 = arith.constant 0 : index
    %c0_11 = arith.constant 0 : index
    %15 = vector.load %arg6[%c0_10, %c0_11] : memref<32x128xbf16, #tpu.memory_space<vmem>>, vector<32x128xbf16>
    %cst_12 = arith.constant dense<0.000000e+00> : vector<8x128xf32>
    %16 = tpu.matmul %14, %15, %cst_12 {dimension_numbers = #tpu.dot_dimension_numbers<[1], [0], [0], [1], [0, 0, 1, 1], [], []>} : vector<8x32xbf16>, vector<32x128xbf16>, vector<8x128xf32> -> vector<8x128xf32>
    %c0_13 = arith.constant 0 : index
    %c0_14 = arith.constant 0 : index
    %17 = vector.load %arg7[%c0_13, %c0_14] : memref<1x128xf32, #tpu.memory_space<vmem>>, vector<1x128xf32>
    %18 = vector.broadcast %17 : vector<1x128xf32> to vector<8x128xf32>
    %19 = arith.addf %16, %18 : vector<8x128xf32>
    %20 = tpu.iota {dimensions = array<i32: 1>} : vector<8x128xi32>
    %c8_i32 = arith.constant 8 : i32
    %21 = vector.broadcast %c8_i32 : i32 to vector<8x128xi32>
    %22 = arith.cmpi slt, %20, %21 : vector<8x128xi32>
    %cst_15 = arith.constant 0xFF800000 : f32
    %23 = vector.broadcast %cst_15 : f32 to vector<8x128xf32>
    %24 = arith.select %22, %19, %23 : vector<8x128xi1>, vector<8x128xf32>
    %cst_16 = arith.constant dense<0xFF800000> : vector<8xf32>
    %25 = vector.multi_reduction <maximumf>, %24, %cst_16 [1] : vector<8x128xf32> to vector<8xf32>
    %26 = vector.shape_cast %25 : vector<8xf32> to vector<8x1xf32>
    %27 = vector.broadcast %26 : vector<8x1xf32> to vector<8x128xf32>
    %28 = arith.subf %24, %27 : vector<8x128xf32>
    %29 = math.exp %28 : vector<8x128xf32>
    %cst_17 = arith.constant dense<0.000000e+00> : vector<8xf32>
    %30 = vector.multi_reduction <add>, %29, %cst_17 [1] : vector<8x128xf32> to vector<8xf32>
    %31 = vector.shape_cast %30 : vector<8xf32> to vector<8x1xf32>
    %32 = tpu.reciprocal %31 {approx = true} : vector<8x1xf32> -> vector<8x1xf32>
    %33 = vector.broadcast %32 : vector<8x1xf32> to vector<8x128xf32>
    %34 = arith.mulf %29, %33 : vector<8x128xf32>
    %c0_18 = arith.constant 0 : index
    %c0_19 = arith.constant 0 : index
    %35 = vector.load %arg8[%c0_18, %c0_19] : memref<8x128xf32, #tpu.memory_space<vmem>>, vector<8x128xf32>
    tpu.vector_store %arg8[%c0_18, %c0_19], %34 {strides = array<i32>} : memref<8x128xf32, #tpu.memory_space<vmem>>, vector<8x128xf32>,
    return
  }
  func.func @transform_0(%arg0: i32) -> (i32, i32) {
    %c0_i32 = arith.constant 0 : i32
    %c0_i32_0 = arith.constant 0 : i32
    return %arg0, %c0_i32 : i32, i32
  }
  func.func @transform_1(%arg0: i32) -> (i32, i32) {
    %c0_i32 = arith.constant 0 : i32
    %c0_i32_0 = arith.constant 0 : i32
    %c0_i32_1 = arith.constant 0 : i32
    return %c0_i32, %c0_i32_0 : i32, i32
  }
  func.func @transform_2(%arg0: i32) -> (i32, i32) {
    %c0_i32 = arith.constant 0 : i32
    %c0_i32_0 = arith.constant 0 : i32
    %c0_i32_1 = arith.constant 0 : i32
    return %c0_i32, %c0_i32_0 : i32, i32
  }
  func.func @transform_3(%arg0: i32) -> (i32, i32) {
    %c0_i32 = arith.constant 0 : i32
    %c0_i32_0 = arith.constant 0 : i32
    %c0_i32_1 = arith.constant 0 : i32
    return %c0_i32, %c0_i32_0 : i32, i32
  }
  func.func @transform_4(%arg0: i32) -> (i32, i32) {
    %c0_i32 = arith.constant 0 : i32
    %c0_i32_0 = arith.constant 0 : i32
    %c0_i32_1 = arith.constant 0 : i32
    return %c0_i32, %c0_i32_0 : i32, i32
  }
  func.func @transform_5(%arg0: i32) -> (i32, i32) {
    %c0_i32 = arith.constant 0 : i32
    %c0_i32_0 = arith.constant 0 : i32
    %c0_i32_1 = arith.constant 0 : i32
    return %c0_i32, %c0_i32_0 : i32, i32
  }
  func.func @transform_6(%arg0: i32) -> (i32, i32) {
    %c0_i32 = arith.constant 0 : i32
    %c0_i32_0 = arith.constant 0 : i32
    %c0_i32_1 = arith.constant 0 : i32
    return %c0_i32, %c0_i32_0 : i32, i32
  }
  func.func @transform_7(%arg0: i32) -> (i32, i32) {
    %c0_i32 = arith.constant 0 : i32
    %c0_i32_0 = arith.constant 0 : i32
    return %arg0, %c0_i32 : i32, i32
  }
}

</mosaic_0001>

<bundles_post_ra>
// kernel: tpu_custom_call.1
= control target key start
LH: loop header
LB: loop body
LE: loop exit
PB: predicated region body
PF: predicated region fallthrough
CT: control target
= control target key end

     0   :  { %12 = vsyncpa [#allocation3], 0  ;;  %s474_s0 = inlined_call_operand.hbm [shape: bf16[8,16], index: 0, kind: input, shape index: {}]   ;;  %s475_s1 = inlined_call_operand.hbm [shape: bf16[16,32], index: 1, kind: input, shape index: {}]   ;;  %s476_s2 = inlined_call_operand.vmem [shape: f32[1,32], index: 2, kind: input, shape index: {}]   ;;  %s477_s3 = inlined_call_operand.hbm [shape: bf16[32,32], index: 3, kind: input, shape index: {}]   ;;  %s478_s4 = inlined_call_operand.vmem [shape: f32[1,32], index: 4, kind: input, shape index: {}]   ;;  %s479_s5 = inlined_call_operand.hbm [shape: bf16[32,128], index: 5, kind: input, shape index: {}]   ;;  %s480_s6 = inlined_call_operand.vmem [shape: f32[1,128], index: 6, kind: input, shape index: {}]   ;;  %s481_s7 = inlined_call_operand.hbm [shape: f32[8,128], index: 7, kind: output, shape index: {}]  }
   0x1   :  { %13 = vsyncpa [#allocation6], 0 }
   0x2   :  { %14 = vsyncpa [#allocation9], 0  ;;  %s31_s26 = sshll.u32 %s475_s1, 4  ;;  %s32_s26 = int_to_ptr.hbm [resolvable:$true] %s31_s26 }
   0x3   :  { %15 = vsyncpa [#allocation4], 0  ;;  %s403_s27 = smov [#allocation5]   ;;  %s21_s8 = sshll.u32 %s474_s0, 4  ;;  %s22_s8 = int_to_ptr.hbm [resolvable:$true] %s21_s8 }
   0x4   :  { %s33_s28 = sshll.u32 %s403_s27, 4  ;;  %s404_s9 = smov 64   ;;  %s34_s28 = int_to_ptr.vmem [resolvable:$true] %s33_s28 }
   0x5   :  { %s405_s10 = smov 4   ;;  %s406_s11 = smov [#allocation2]  }
   0x6   :  { %39 = dma.hbm_to_vmem [thread:$0]  %s32_s26, 128, %s34_s28, [#allocation6], %s404_s9, %s404_s9, %s405_s10  }
   0x7   :  { %s23_s12 = sshll.u32 %s406_s11, 4  ;;  %s46_s15 = sshll.u32 %s477_s3, 4  ;;  %s24_s12 = int_to_ptr.vmem [resolvable:$true] %s23_s12  ;;  %s47_s15 = int_to_ptr.hbm [resolvable:$true] %s46_s15 }
   0x8   :  { %26 = dma.hbm_to_vmem [thread:$0]  %s22_s8, 64, %s24_s12, [#allocation3]  }
   0x9   :  { %s61_s17 = sshll.u32 %s479_s5, 4  ;;  %s407_s18 = smov [#allocation7]   ;;  %s62_s17 = int_to_ptr.hbm [resolvable:$true] %s61_s17 }
   0xa   :  { %s48_s19 = sshll.u32 %s407_s18, 4  ;;  %s408_s0 = smov [#allocation8]   ;;  %s49_s19 = int_to_ptr.vmem [resolvable:$true] %s48_s19 }
   0xb   :  { %54 = dma.hbm_to_vmem [thread:$0]  %s47_s15, 256, %s49_s19, [#allocation6], %s404_s9, %s404_s9, %s405_s10  }
   0xc   :  { %s63_s20 = sshll.u32 %s408_s0, 4  ;;  %s64_s20 = int_to_ptr.vmem [resolvable:$true] %s63_s20 }
   0xd   :  { %69 = dma.hbm_to_vmem [thread:$0]  %s62_s17, 256, %s64_s20, [#allocation9], %s404_s9, %s404_s9, %s405_s10  }
   0xe   :  { %395 = dma.done.wait [#allocation3], 64  }
   0xf   :  { %396 = vsyncadd [#allocation3], 4294967232 }
  0x10   :  { %397 = dma.done.wait [#allocation6], 384  }
  0x11   :  { %398 = vsyncadd [#allocation6], 4294966912 }
  0x12   :  { %399 = dma.done.wait [#allocation9], 256  }
  0x13   :  { %400 = vsyncadd [#allocation9], 4294967040  ;;  %v252_v0 = vld [vmem:[#allocation5] sm:$0xff]  ;;  %v89_v1 = vld [vmem:[#allocation2] sm:$0xf]  ;;  %vm102_vm0 = vcmask 130048   ;;  %v196_v18 = vlaneseq }
  0x14   :  { %113 = vmatpush.bf16.msra.mxu0 %v252_v0  ;;  %v254_v2 = vld [vmem:[#allocation7 + $0x8] sm:$0xff]  ;;  %v253_v3 = vld [vmem:[#allocation7] sm:$0xff]  ;;  %v264_v4 = vld [vmem:[%s476_s2] ss:$0 sm:$0xff]  ;;  %vm141_vm1 = vcmask 261120  }
  0x15   :  { %151 = vmatpush.bf16.msra.mxu1 %v254_v2  ;;  %v256_v10 = vld [vmem:[#allocation8 + $0x8] sm:$0xff]  ;;  %v255_v11 = vld [vmem:[#allocation8] sm:$0xff]  ;;  %v197_v19 = vand.u32 127, %v196_v18 }
  0x16   :  { %189 = vmatpush.bf16.msra.mxu2 %v256_v10  ;;  %v265_v12 = vld [vmem:[%s478_s4] ss:$0 sm:$0xff]  ;;  %s409_s4 = smov [#allocation10]  }
  0x17   :  { %233 = vmatmul.msk.bf16.vlgmr.msra.gmra.mxu0 %vm102_vm0, %v89_v1  ;;  %v266_v20 = vld [vmem:[%s480_s6] ss:$0 sm:$0xff]  ;;  %vm198_vm2 = vcmp.lt.s32.totalorder %v197_v19, 8  ;;  %s215_s24 = sshll.u32 %s409_s4, 4  ;;  %s217_s6 = sshll.u32 %s481_s7, 4  ;;  %s216_s24 = int_to_ptr.vmem [resolvable:$true] %s215_s24  ;;  %s218_s6 = int_to_ptr.hbm [resolvable:$true] %s217_s6 }
  0x19   :  { %152 = vmatpush.bf16.msra.mxu1 %v253_v3 }
  0x1a   :  { %190 = vmatpush.bf16.msra.mxu2 %v255_v11 }
  0x94   :  { %v115_v5 = vpop.f32.mrf.mxu0 }
  0x95   :  { %v116_v6 = vadd.f32 %v264_v4, %v115_v5 }
  0x97   :  { %267 = vtanh.f32 %v116_v6 }
  0x9c   :  { %v117_v7 = vpop.f32.mrf.mxu0 }
  0x9d   :  { %v268_v8 = vpop.eup %267 }
  0x9e   :  { %v120_v9 = vpack.c.bf16 %v268_v8, %v268_v8 }
  0xa0   :  { %242 = vmatmul.msk.bf16.vlgmr.msra.gmra.mxu1 %vm141_vm1, %v120_v9 }
 0x11d   :  { %v154_v13 = vpop.f32.mrf.mxu1 }
 0x11e   :  { %v155_v14 = vadd.f32 %v265_v12, %v154_v13 }
 0x120   :  { %269 = vtanh.f32 %v155_v14 }
 0x125   :  { %v156_v15 = vpop.f32.mrf.mxu1 }
 0x126   :  { %v270_v16 = vpop.eup %269 }
 0x127   :  { %v159_v17 = vpack.c.bf16 %v270_v16, %v270_v16 }
 0x129   :  { %251 = vmatmul.msk.bf16.vlgmr.msra.gmra.mxu2 %vm141_vm1, %v159_v17 }
 0x1ac   :  { %v192_v21 = vpop.f32.mrf.mxu2 }
 0x1ad   :  { %v193_v22 = vadd.f32 %v266_v20, %v192_v21 }
 0x1af   :  { %v199_v23 = vsel %vm198_vm2, %v193_v22, -inf }
 0x1b0   :  { %200 = vmax.xlane.f32.xlu0 %v199_v23 }
 0x1b4   :  { %v194_v24 = vpop.f32.mrf.mxu2 }
 0x223   :  { %v201_v25 = vpop.xlane.xlu0 %200 }
 0x224   :  { %v202_v26 = vsub.f32 %v199_v23, %v201_v25 }
 0x226   :  { %v203_v27 = vmul.f32 1.442695, %v202_v26 }
 0x228   :  { %271 = vpow2.f32 %v203_v27 }
 0x22e   :  { %v272_v28 = vpop.eup %271 }
 0x22f   :  { %205 = vadd.xlane.f32.xlu0 %v272_v28 }
 0x2a2   :  { %v206_v29 = vpop.xlane.xlu0 %205 }
 0x2a3   :  { %273 = vrcp.f32 %v206_v29 }
 0x2a9   :  { %v274_v30 = vpop.eup %273 }
 0x2aa   :  { %v208_v31 = vmul.f32 %v274_v30, %v272_v28 }
 0x2ac   :  { %209 = vst [vmem:[#allocation10] sm:$0xff] %v208_v31 }
 0x2ad   :  { %220 = dma.vmem_to_hbm [thread:$0]  %s216_s24, 128, %s218_s6, [#allocation4]  }
 0x2ae   :  { %401 = dma.done.wait [#allocation4], 128  }
 0x2af   :  { %402 = vsyncadd [#allocation4], 4294967168 }
 0x2b0   :  { %225 = vsyncpa [#allocation3], 1 }
 0x2b1   :  { %226 = vsyncpa [#allocation6], 1 }
 0x2b2   :  { %227 = vsyncpa [#allocation9], 1 }
 0x2b3   :  { %228 = vsyncpa [#allocation4], 1 }

</bundles_post_ra>
